<compile_context>
chip_gen: v5e
topology: v5e:2x2
jax: 0.10.0
libtpu: 0.0.40
codegen_flags: <defaults>
</compile_context>

<pallas_src>
import numpy as np
import jax
import jax.numpy as jnp
from jax.experimental import pallas as pl
from jax.experimental.pallas import tpu as pltpu


def _pos_emb_kernel(t_ref, div_ref, phase_ref, o_ref):
    # t_ref:     (TB, 1)  float32 timesteps
    # div_ref:   (1,  D)  float32 per-column frequency  exp(-2*(j//2)*ln(1e4)/D)
    # phase_ref: (1,  D)  float32 per-column phase (0 on even cols, pi/2 on odd)
    # o_ref:     (TB, D)  float32 embeddings
    # sin(x)       on even columns
    # sin(x+pi/2)  == cos(x) on odd columns   -> single transcendental per elem
    o_ref[...] = jnp.sin(t_ref[...] * div_ref[...] + phase_ref[...])


def transformer_positional_embedding(timestep, dimension, max_timesteps=1000,
                                     block_b=512):
    """Pallas equivalent of TransformerPositionalEmbedding.forward.

    timestep: int array of shape (B,), values in [0, max_timesteps)
    returns:  float32 array of shape (B, dimension)
    """
    assert dimension % 2 == 0, "Embedding dimension must be even"
    del max_timesteps  # table never materialized; any timestep value is valid
    B = timestep.shape[0]
    D = dimension

    # ---- trace-time column constants (shape (1, D)) -------------------------
    col = np.arange(D)
    log_term = np.log(10000.0) / D
    div_term = np.exp(-(2.0 * (col // 2)) * log_term).astype(np.float32)[None, :]
    phase = np.where(col % 2 == 0, 0.0, np.pi / 2.0).astype(np.float32)[None, :]
    div_term = jnp.asarray(div_term)
    phase = jnp.asarray(phase)

    # ---- tile over B (TB multiple of 8 for sublane alignment) ---------------
    TB = min(block_b, max(8, ((B + 7) // 8) * 8))
    TB = ((TB + 7) // 8) * 8
    B_pad = ((B + TB - 1) // TB) * TB

    t_f32 = timestep.astype(jnp.float32).reshape(B, 1)  # glue: cast + make 2-D
    if B_pad != B:
        t_f32 = jnp.pad(t_f32, ((0, B_pad - B), (0, 0)))

    grid = (B_pad // TB,)
    out = pl.pallas_call(
        _pos_emb_kernel,
        out_shape=jax.ShapeDtypeStruct((B_pad, D), jnp.float32),
        grid_spec=pltpu.PrefetchScalarGridSpec(
            num_scalar_prefetch=0,
            grid=grid,
            in_specs=[
                pl.BlockSpec((TB, 1), lambda i: (i, 0)),   # timesteps (per tile)
                pl.BlockSpec((1, D), lambda i: (0, 0)),    # div_term (constant)
                pl.BlockSpec((1, D), lambda i: (0, 0)),    # phase    (constant)
            ],
            out_specs=pl.BlockSpec((TB, D), lambda i: (i, 0)),
        ),
        compiler_params=pltpu.CompilerParams(
            # Batch tiles are independent -> shard across TCs on v7x; no-op on
            # single-TC v5e/v6e.
            dimension_semantics=("parallel",)),
    )(t_f32, div_term, phase)

    # TODO(synk): for production D < 128, present a lane-dense reshaped output
    # slab to avoid masked vst; skipped here to keep the demo layout simple.
    return out[:B] if B_pad != B else out


def _reference_pe_matrix(dimension, max_timesteps=1000):
    """Pure-JAX replica of the PyTorch __init__ table (for verification)."""
    pe = jnp.zeros((max_timesteps, dimension), jnp.float32)
    even_indices = jnp.arange(0, dimension, 2, dtype=jnp.float32)
    log_term = jnp.log(jnp.float32(10000.0)) / jnp.float32(dimension)
    div_term = jnp.exp(even_indices * -log_term)
    timesteps = jnp.arange(max_timesteps, dtype=jnp.float32)[:, None]
    pe = pe.at[:, 0::2].set(jnp.sin(timesteps * div_term))
    pe = pe.at[:, 1::2].set(jnp.cos(timesteps * div_term))
    return pe


if __name__ == "__main__":
    key = jax.random.PRNGKey(0)
    B = 8
    DIM = 32
    MAX_T = 1000

    timestep = jax.random.randint(key, (B,), 0, MAX_T, dtype=jnp.int32)

    out = transformer_positional_embedding(timestep, DIM, MAX_T)
    out = jax.block_until_ready(out)

    ref = _reference_pe_matrix(DIM, MAX_T)[timestep]
    assert out.shape == (B, DIM) and out.dtype == jnp.float32
    assert jnp.allclose(out, ref, atol=1e-5, rtol=1e-5)

    print("KERNEL_OK")
</pallas_src>

<mosaic_0001>
module attributes {stable_mosaic.version = 11 : i64} {
  func.func @_pos_emb_kernel(%arg0: i32, %arg1: memref<8x1xf32, #tpu.memory_space<vmem>>, %arg2: memref<1x32xf32, #tpu.memory_space<vmem>>, %arg3: memref<1x32xf32, #tpu.memory_space<vmem>>, %arg4: memref<8x32xf32, #tpu.memory_space<vmem>>) attributes {dimension_semantics = [#tpu.dimension_semantics<parallel>], iteration_bounds = array<i64: 1>, scalar_prefetch = 0 : i64, scratch_operands = 0 : i64, tpu.core_type = #tpu.core_type<tc>, window_params = [{transform_indices = @transform_0, window_bounds = array<i64: 8, 1>}, {pipeline_mode = #tpu.pipeline_mode<synchronous>, transform_indices = @transform_1, window_bounds = array<i64: 1, 32>}, {pipeline_mode = #tpu.pipeline_mode<synchronous>, transform_indices = @transform_2, window_bounds = array<i64: 1, 32>}, {transform_indices = @transform_3, window_bounds = array<i64: 8, 32>}]} {
    %c0 = arith.constant 0 : index
    %c0_0 = arith.constant 0 : index
    %0 = vector.load %arg1[%c0, %c0_0] : memref<8x1xf32, #tpu.memory_space<vmem>>, vector<8x1xf32>
    %c0_1 = arith.constant 0 : index
    %c0_2 = arith.constant 0 : index
    %1 = vector.load %arg2[%c0_1, %c0_2] : memref<1x32xf32, #tpu.memory_space<vmem>>, vector<1x32xf32>
    %2 = vector.broadcast %0 : vector<8x1xf32> to vector<8x32xf32>
    %3 = vector.broadcast %1 : vector<1x32xf32> to vector<8x32xf32>
    %4 = arith.mulf %2, %3 : vector<8x32xf32>
    %c0_3 = arith.constant 0 : index
    %c0_4 = arith.constant 0 : index
    %5 = vector.load %arg3[%c0_3, %c0_4] : memref<1x32xf32, #tpu.memory_space<vmem>>, vector<1x32xf32>
    %6 = vector.broadcast %5 : vector<1x32xf32> to vector<8x32xf32>
    %7 = arith.addf %4, %6 : vector<8x32xf32>
    %8 = math.sin %7 : vector<8x32xf32>
    %c0_5 = arith.constant 0 : index
    %c0_6 = arith.constant 0 : index
    %9 = vector.load %arg4[%c0_5, %c0_6] : memref<8x32xf32, #tpu.memory_space<vmem>>, vector<8x32xf32>
    tpu.vector_store %arg4[%c0_5, %c0_6], %8 {strides = array<i32>} : memref<8x32xf32, #tpu.memory_space<vmem>>, vector<8x32xf32>,
    return
  }
  func.func @transform_0(%arg0: i32) -> (i32, i32) {
    %c0_i32 = arith.constant 0 : i32
    %c0_i32_0 = arith.constant 0 : i32
    return %arg0, %c0_i32 : i32, i32
  }
  func.func @transform_1(%arg0: i32) -> (i32, i32) {
    %c0_i32 = arith.constant 0 : i32
    %c0_i32_0 = arith.constant 0 : i32
    %c0_i32_1 = arith.constant 0 : i32
    return %c0_i32, %c0_i32_0 : i32, i32
  }
  func.func @transform_2(%arg0: i32) -> (i32, i32) {
    %c0_i32 = arith.constant 0 : i32
    %c0_i32_0 = arith.constant 0 : i32
    %c0_i32_1 = arith.constant 0 : i32
    return %c0_i32, %c0_i32_0 : i32, i32
  }
  func.func @transform_3(%arg0: i32) -> (i32, i32) {
    %c0_i32 = arith.constant 0 : i32
    %c0_i32_0 = arith.constant 0 : i32
    return %arg0, %c0_i32 : i32, i32
  }
}

</mosaic_0001>

<bundles_post_ra>
// kernel: tpu_custom_call.1
= control target key start
LH: loop header
LB: loop body
LE: loop exit
PB: predicated region body
PF: predicated region fallthrough
CT: control target
= control target key end

     0   :  { %v244_v1 = vmov 0   ;;  %s345_s0 = inlined_call_operand.vmem [shape: f32[8,1], index: 0, kind: input, shape index: {}]   ;;  %s346_s1 = inlined_call_operand.vmem [shape: f32[1,32], index: 1, kind: input, shape index: {}]   ;;  %s347_s2 = inlined_call_operand.vmem [shape: f32[1,32], index: 2, kind: input, shape index: {}]   ;;  %s348_s3 = inlined_call_operand.hbm [shape: f32[8,32], index: 3, kind: output, shape index: {}]  }
   0x1   :  { %v15_v0 = vld [vmem:[%s345_s0] sm:$0xff]  ;;  %215 = vset.pattern.permute.xlu0 %v244_v1 }
   0x2   :  { %19 = vperm.xlu0 %215, %v15_v0  }
   0x3   :  { %8 = vsyncpa [#allocation3], 0  ;;  %v216_v2 = vld [vmem:[%s346_s1] ss:$0 sm:$0xff]  ;;  %v245_v18 = vmov 683565275  }
   0x4   :  { %v217_v3 = vld [vmem:[%s347_s2] ss:$0 sm:$0xff]  ;;  %v246_v20 = vmov 2475754826   ;;  %v247_v23 = vmov 2131351028  }
   0x5   :  { %v248_v26 = vmov 2102212464   ;;  %v249_v29 = vmov 920167782   ;;  %v250_v32 = vmov 1326507024  }
   0x6   :  { %s251_s0 = smov [#allocation2]   ;;  %s195_s19 = sshll.u32 %s348_s3, 4  ;;  %s196_s19 = int_to_ptr.hbm [resolvable:$true] %s195_s19 }
   0x7   :  { %s193_s1 = sshll.u32 %s251_s0, 4  ;;  %s194_s1 = int_to_ptr.vmem [resolvable:$true] %s193_s1 }
  0x74   :  { %v20_v4 = vpop.permute.xlu0 %19 }
  0x75   :  { %v25_v5 = vmul.f32 %v216_v2, %v20_v4 }
  0x77   :  { %v282_v6 = vadd.f32 %v217_v3, %v25_v5 }
  0x79   :  { %v34_v7 = vand.u32 2139095040, %v282_v6  ;;  %v31_v10 = vand.u32 2147483647, %v282_v6  ;;  %vm33_vm12 = vcmp.lt.s32.totalorder %v282_v6, 0 }
  0x7b   :  { %v35_v8 = vshrl.u32 %v34_v7, 23  ;;  %v38_v12 = vand.u32 8388607, %v31_v10  ;;  %vm32_vm13 = vcmp.le.f32.partialorder %v31_v10, 0.7853982 }
  0x7d   :  { %v204_v9 = vadd.s32 4294967169, %v35_v8  ;;  %v39_v16 = vor.u32 8388608, %v38_v12 }
  0x7f   :  { %v41_v11 = vadd.s32 1, %v204_v9  ;;  %v299_v39 = vshll.u32 %v39_v16, 8 }
  0x81   :  { %vm42_vm0 = vcmp.gt.s32.totalorder %v41_v11, 0  ;;  %v80_v48 = vand.u32 65535, %v299_v39  ;;  %v81_v53 = vshrl.u32 %v299_v39, 16 }
  0x82   :  { %v43_v13 = vsel %vm42_vm0, %v41_v11, 0 }
  0x83   :  { %v45_v14 = vand.u32 31, %v43_v13  ;;  %v290_v17 = vshrl.u32 %v43_v13, 5 }
  0x85   :  { %v288_v15 = vsub.s32 32, %v45_v14  ;;  %v48_v19 = vshll.u32 %v245_v18, %v45_v14  ;;  %v51_v21 = vshll.u32 %v246_v20, %v45_v14  ;;  %v54_v25 = vshll.u32 %v247_v23, %v45_v14 }
  0x86   :  { %v57_v28 = vshll.u32 %v248_v26, %v45_v14  ;;  %v60_v31 = vshll.u32 %v249_v29, %v45_v14  ;;  %vm63_vm1 = vcmp.lt.s32.totalorder %v290_v17, 1  ;;  %vm66_vm2 = vcmp.lt.s32.totalorder %v290_v17, 4 }
  0x87   :  { %v49_v22 = vshrl.u32 %v246_v20, %v288_v15  ;;  %v52_v24 = vshrl.u32 %v247_v23, %v288_v15  ;;  %v55_v27 = vshrl.u32 %v248_v26, %v288_v15  ;;  %v58_v30 = vshrl.u32 %v249_v29, %v288_v15 }
  0x88   :  { %v61_v33 = vshrl.u32 %v250_v32, %v288_v15  ;;  %vm65_vm3 = vcmp.lt.s32.totalorder %v290_v17, 3  ;;  %vm64_vm4 = vcmp.lt.s32.totalorder %v290_v17, 2  ;;  %v47_v12 = vshrl.u32 %v245_v18, %v288_v15 }
  0x89   :  { %v50_v34 = vor.u32 %v49_v22, %v48_v19  ;;  %v53_v35 = vor.u32 %v52_v24, %v51_v21  ;;  %v56_v36 = vor.u32 %v55_v27, %v54_v25  ;;  %v59_v37 = vor.u32 %v58_v30, %v57_v28 }
  0x8a   :  { %v62_v38 = vor.u32 %v61_v33, %v60_v31 }
  0x8b   :  { %v71_v40 = vsel %vm63_vm1, %v50_v34, %v53_v35  ;;  %v75_v41 = vsel %vm63_vm1, %v53_v35, %v56_v36  ;;  %v72_v42 = vsel %vm66_vm2, %v59_v37, 920167782  ;;  %v68_v5 = vsel %vm66_vm2, %v56_v36, 2102212464 }
  0x8c   :  { %v76_v43 = vsel %vm66_vm2, %v62_v38, 1326507024  ;;  %v73_v44 = vsel %vm65_vm3, %v56_v36, %v72_v42  ;;  %v67_v22 = vsel %vm63_vm1, %v47_v12, %v50_v34  ;;  %v69_v23 = vsel %vm65_vm3, %v53_v35, %v68_v5 }
  0x8d   :  { %v77_v45 = vsel %vm65_vm3, %v59_v37, %v76_v43  ;;  %v74_v46 = vsel %vm64_vm4, %v71_v40, %v73_v44  ;;  %v70_v15 = vsel %vm64_vm4, %v67_v22, %v69_v23  ;;  %vm186_vm1 = vcmask 261120  }
  0x8e   :  { %v78_v47 = vsel %vm64_vm4, %v75_v41, %v77_v45  ;;  %v104_v51 = vand.u32 65535, %v74_v46  ;;  %v105_v52 = vshrl.u32 %v74_v46, 16  ;;  %v124_v30 = vmul.u32 %v299_v39, %v70_v15 }
  0x8f   :  { %v82_v49 = vand.u32 65535, %v78_v47  ;;  %v83_v50 = vshrl.u32 %v78_v47, 16  ;;  %vm174_vm2 = vweird.f32 %v282_v6 }
  0x90   :  { %v107_v55 = vmul.u32 %v105_v52, %v80_v48  ;;  %v108_v57 = vmul.u32 %v104_v51, %v81_v53  ;;  %v106_v60 = vmul.u32 %v104_v51, %v80_v48  ;;  %v109_v63 = vmul.u32 %v105_v52, %v81_v53 }
  0x91   :  { %v85_v54 = vmul.u32 %v83_v50, %v80_v48  ;;  %v86_v56 = vmul.u32 %v82_v49, %v81_v53  ;;  %v84_v58 = vmul.u32 %v82_v49, %v80_v48  ;;  %v87_v62 = vmul.u32 %v83_v50, %v81_v53 }
  0x92   :  { %v110_v61 = vshll.u32 %v107_v55, 16  ;;  %v112_v2 = vshll.u32 %v108_v57, 16  ;;  %v111_v20 = vshrl.u32 %v107_v55, 16  ;;  %v113_v26 = vshrl.u32 %v108_v57, 16 }
  0x93   :  { %v88_v59 = vshll.u32 %v85_v54, 16  ;;  %v90_v0 = vshll.u32 %v86_v56, 16  ;;  %v89_v16 = vshrl.u32 %v85_v54, 16  ;;  %v91_v24 = vshrl.u32 %v86_v56, 16 }
  0x94   :  { %vm114_vm6 = vc.u32 %v106_v60, %v110_v61  ;;  %v116_v4 = vadd.s32 %v110_v61, %v106_v60 }
  0x95   :  { %vm92_vm5 = vc.u32 %v84_v58, %v88_v59  ;;  %v94_v3 = vadd.s32 %v88_v59, %v84_v58  ;;  %v115_v8 = vsel %vm114_vm6, 1, %v244_v1 }
  0x96   :  { %v93_v7 = vsel %vm92_vm5, 1, %v244_v1  ;;  %v117_v11 = vadd.s32 %v115_v8, %v109_v63  ;;  %vm118_vm8 = vc.u32 %v116_v4, %v112_v2  ;;  %v120_v28 = vadd.s32 %v116_v4, %v112_v2 }
  0x97   :  { %v95_v9 = vadd.s32 %v93_v7, %v87_v62  ;;  %vm96_vm7 = vc.u32 %v94_v3, %v90_v0  ;;  %v119_v14 = vsel %vm118_vm8, 1, %v244_v1 }
  0x98   :  { %v97_v13 = vsel %vm96_vm7, 1, %v244_v1  ;;  %v121_v21 = vadd.s32 %v119_v14, %v117_v11 }
  0x99   :  { %v99_v19 = vadd.s32 %v97_v13, %v95_v9 }
  0x9a   :  { %v122_v27 = vadd.s32 %v121_v21, %v111_v20 }
  0x9b   :  { %v100_v25 = vadd.s32 %v99_v19, %v89_v16 }
  0x9c   :  { %v123_v1 = vadd.s32 %v122_v27, %v113_v26 }
  0x9d   :  { %v101_v18 = vadd.s32 %v100_v25, %v91_v24 }
  0x9e   :  { %v127_v29 = vadd.s32 1, %v123_v1 }
  0x9f   :  { %vm126_vm9 = vc.u32 %v101_v18, %v120_v28  ;;  %v125_v42 = vadd.s32 %v120_v28, %v101_v18 }
  0xa0   :  { %v128_v31 = vsel %vm126_vm9, %v127_v29, %v123_v1 }
  0xa1   :  { %v129_v32 = vadd.s32 %v128_v31, %v124_v30 }
  0xa3   :  { %v130_v33 = vadd.s32 536870912, %v129_v32 }
  0xa5   :  { %v131_v34 = vshrl.u32 %v130_v33, 30 }
  0xa7   :  { %v132_v36 = vshll.u32 %v131_v34, 30  ;;  %v155_v55 = vsub.s32 4, %v131_v34 }
  0xa9   :  { %v133_v35 = vsub.s32 %v129_v32, %v132_v36  ;;  %v156_v60 = vsel %vm33_vm12, %v155_v55, %v131_v34 }
  0xaa   :  { %v158_v63 = vsel %vm32_vm13, 0, %v156_v60 }
  0xab   :  { %vm134_vm10 = vcmp.lt.s32.totalorder %v133_v35, 0  ;;  %v135_v37 = vsub.s32 0, %v133_v35  ;;  %v175_v5 = vadd.s32 3, %v158_v63 }
  0xad   :  { %v136_v38 = vsel %vm134_vm10, %v135_v37, %v133_v35  ;;  %v176_v11 = vand.u32 3, %v175_v5 }
  0xae   :  { %v137_v40 = vclz %v136_v38 }
  0xaf   :  { %vm178_vm14 = vcmp.eq.s32.totalorder %v176_v11, 0  ;;  %vm181_vm15 = vcmp.eq.s32.totalorder %v176_v11, 2  ;;  %vm177_vm0 = vcmp.lt.s32.totalorder %v176_v11, 2 }
  0xb0   :  { %v205_v41 = vadd.s32 4294967294, %v137_v40 }
  0xb2   :  { %vm206_vm11 = vcmp.lt.s32.totalorder %v205_v41, 0 }
  0xb3   :  { %v140_v17 = vsel %vm206_vm11, 0, %v205_v41 }
  0xb4   :  { %v141_v43 = vsub.s32 32, %v140_v17  ;;  %v145_v44 = vsub.s32 4294967266, %v140_v17  ;;  %v142_v45 = vshll.u32 %v133_v35, %v140_v17 }
  0xb6   :  { %v143_v46 = vshrl.u32 %v125_v42, %v141_v43  ;;  %v146_v47 = vadd.s32 127, %v145_v44 }
  0xb8   :  { %v144_v39 = vor.u32 %v143_v46, %v142_v45  ;;  %v147_v48 = vshll.u32 %v146_v47, 23 }
  0xba   :  { %v148_v49 = vor.u32 4788187, %v147_v48  ;;  %v151_v51 = vcvt.s32.f32 %v144_v39 }
  0xbc   :  { %v149_v50 = vand.u32 2147483647, %v148_v49 }
  0xbe   :  { %v152_v52 = vmul.f32 %v151_v51, %v149_v50 }
  0xc0   :  { %v153_v53 = vxor.u32 2147483648, %v152_v52 }
  0xc2   :  { %v154_v54 = vsel %vm33_vm12, %v153_v53, %v152_v52 }
  0xc3   :  { %v157_v56 = vsel %vm32_vm13, %v282_v6, %v154_v54 }
  0xc4   :  { %v159_v57 = vmul.f32 %v157_v56, %v157_v56 }
  0xc6   :  { %v160_v58 = vmul.f32 -0.001358992, %v159_v57  ;;  %v167_v59 = vmul.f32 -0.00019511016, %v159_v57 }
  0xc8   :  { %v161_v61 = vadd.f32 0.041655596, %v160_v58  ;;  %v168_v62 = vadd.f32 0.008332121, %v167_v59 }
  0xca   :  { %v162_v0 = vmul.f32 %v161_v61, %v159_v57  ;;  %v169_v2 = vmul.f32 %v168_v62, %v159_v57 }
  0xcc   :  { %v163_v3 = vadd.f32 -0.4999988, %v162_v0  ;;  %v170_v4 = vadd.f32 -0.16666654, %v169_v2 }
  0xce   :  { %v164_v7 = vmul.f32 %v163_v3, %v159_v57  ;;  %v171_v8 = vmul.f32 %v170_v4, %v159_v57 }
  0xd0   :  { %v165_v9 = vadd.f32 1.0, %v164_v7  ;;  %v172_v10 = vadd.f32 1.0, %v171_v8 }
  0xd2   :  { %v173_v12 = vmul.f32 %v172_v10, %v157_v56  ;;  %v182_v13 = vxor.u32 2147483648, %v165_v9 }
  0xd4   :  { %v179_v14 = vxor.u32 2147483648, %v173_v12  ;;  %v183_v19 = vsel %vm181_vm15, %v182_v13, %v173_v12 }
  0xd6   :  { %v180_v16 = vsel %vm178_vm14, %v165_v9, %v179_v14 }
  0xd7   :  { %v184_v20 = vsel %vm177_vm0, %v180_v16, %v183_v19 }
  0xd8   :  { %v185_v21 = vsel %vm174_vm2, nan, %v184_v20 }
  0xd9   :  { %187 = vst.msk [vmem:[#allocation2] sm:$0xff] %vm186_vm1, %v185_v21 }
  0xda   :  { %198 = dma.vmem_to_hbm [thread:$0]  %s194_s1, 128, %s196_s19, [#allocation3]  }
  0xdb   :  { %242 = dma.done.wait [#allocation3], 128  }
  0xdc   :  { %243 = vsyncadd [#allocation3], 4294967168 }
  0xdd   :  { %203 = vsyncpa [#allocation3], 1 }

</bundles_post_ra>
